<compile_context>
chip_gen: v7x
topology: tpu7x:2x2x1
jax: 0.10.0
libtpu: 0.0.40
codegen_flags: <defaults>
</compile_context>

<pallas_src>
from functools import partial

import numpy as np
import jax
import jax.numpy as jnp
from jax.experimental import pallas as pl
from jax.experimental.pallas import tpu as pltpu


# ----------------------------- Pallas kernel ------------------------------ #
def _q_relu_kernel(params_ref, x_ref, o_ref, *, apply_relu):
    """Elementwise multi-level quantized ReLU.

    params_ref : SMEM (3*K,) f32, triple i = [inv_a_i, n_lv_i - 1, c_i*softmask_i/(n_lv_i-1)]
    x_ref/o_ref: VMEM (TILE_R, 128) tiles of the flattened activation.
    """
    x = x_ref[...].astype(jnp.float32)
    if apply_relu:
        x = jnp.maximum(x, 0.0)                       # F.relu
    acc = jnp.zeros_like(x)
    K = params_ref.shape[0] // 3
    for i in range(K):                                # static unroll over bit candidates
        inv_a = params_ref[3 * i + 0]
        n_lv_m1 = params_ref[3 * i + 1]
        coeff = params_ref[3 * i + 2]                 # c_i * softmask_i / (n_lv_i - 1)
        x_t = jnp.clip(x * inv_a, 0.0, 1.0)           # F.hardtanh(x / a, 0, 1)
        acc = acc + jnp.round(x_t * n_lv_m1) * coeff  # RoundQuant (round-half-even, like torch)
    o_ref[...] = acc.astype(o_ref.dtype)


# ------------------------------ JAX wrapper -------------------------------- #
def q_relu_forward(x, a_param, c_param, theta, bits, *, gumbel_key, tau=1.0,
                   act_func=True):
    """Returns (x_bar, act_size) exactly like Q_ReLU.forward."""
    # fp32 passthrough decision on concrete Python values (jit/trace safe).
    bits_list = [float(b) for b in np.asarray(bits, dtype=np.float64).reshape(-1)]
    if len(bits_list) == 1 and bits_list[0] == 32.0:
        y = jnp.maximum(x, 0.0) if act_func else x
        return y, jnp.float32(32.0)

    bits_arr = jnp.asarray(bits_list, jnp.float32)
    n_lvs = 2.0 ** bits_arr                                      # self.n_lvs
    a_sp = jax.nn.softplus(a_param)                              # grad_scale is identity fwd
    c_sp = jax.nn.softplus(c_param)
    gumbel = jax.random.gumbel(gumbel_key, theta.shape, dtype=jnp.float32)
    softmask = jax.nn.softmax((theta + gumbel) / tau, axis=0)    # F.gumbel_softmax(hard=False)

    # Divide-free per-element math: precompute reciprocals on K scalars (free).
    inv_a = 1.0 / a_sp
    n_lv_m1 = n_lvs - 1.0
    coeff = c_sp * softmask / n_lv_m1
    # Flat 1-D (3K,) SMEM table: [inv_a_i, n_lv_m1_i, coeff_i] per candidate.
    params = jnp.stack([inv_a, n_lv_m1, coeff], axis=1).reshape(-1).astype(jnp.float32)

    # ---- view as a lane-dense (rows, 128) slab; large row tiles ----
    LANE, SUB = 128, 8
    orig_shape = x.shape
    orig_dtype = x.dtype
    total = int(np.prod(orig_shape))
    rows = pl.cdiv(total, LANE)

    # Big tiles amortize per-step overhead; (512,128) f32 = 256 KiB, so even
    # 2x double-buffered in + out tiles (~1 MiB) fit v5e's 16 MiB scoped VMEM.
    TILE_R = 512 if rows >= 512 else ((rows + SUB - 1) // SUB) * SUB
    rows_padded = ((rows + TILE_R - 1) // TILE_R) * TILE_R
    pad = rows_padded * LANE - total

    x_flat = x.reshape(-1)
    if pad:
        # Zero padding is safe: relu/clip/round of 0 is 0 and the tail is sliced off.
        x_flat = jnp.pad(x_flat, (0, pad))
    x_slab = x_flat.reshape(rows_padded, LANE)

    grid = (rows_padded // TILE_R,)

    out = pl.pallas_call(
        partial(_q_relu_kernel, apply_relu=bool(act_func)),
        out_shape=jax.ShapeDtypeStruct((rows_padded, LANE), orig_dtype),
        grid_spec=pltpu.PrefetchScalarGridSpec(
            num_scalar_prefetch=0,
            grid=grid,
            in_specs=[
                pl.BlockSpec(memory_space=pltpu.MemorySpace.SMEM),     # params (3K,)
                pl.BlockSpec((TILE_R, LANE), lambda r: (r, 0)),        # x tile
            ],
            out_specs=pl.BlockSpec((TILE_R, LANE), lambda r: (r, 0)),
        ),
        compiler_params=pltpu.CompilerParams(
            dimension_semantics=("parallel",),   # lets v7x shard the grid across its 2 TCs
        ),
    )(params, x_slab)

    if pad:
        x_bar = out.reshape(-1)[:total].reshape(orig_shape)
    else:
        x_bar = out.reshape(orig_shape)          # no extra HBM pass when size is tile-aligned
    act_size = jnp.sum(softmask * bits_arr)      # (softmask * bits).sum()
    return x_bar, act_size


# ---------------------------- pure-JAX reference --------------------------- #
def q_relu_reference(x, a_param, c_param, theta, bits, *, gumbel_key, tau=1.0,
                     act_func=True):
    # Same forward function as the torch module, written with the same
    # reciprocal reassociation as the kernel so the numerical comparison is
    # not sensitive to .5 rounding ties at quantization-bin boundaries.
    bits_arr = jnp.asarray(bits, jnp.float32)
    n_lvs = 2.0 ** bits_arr
    a_sp = jax.nn.softplus(a_param)
    c_sp = jax.nn.softplus(c_param)
    gumbel = jax.random.gumbel(gumbel_key, theta.shape, dtype=jnp.float32)
    softmask = jax.nn.softmax((theta + gumbel) / tau, axis=0)
    xr = jnp.maximum(x, 0.0) if act_func else x
    xr = xr.astype(jnp.float32)
    x_bar = jnp.zeros_like(xr)
    for i in range(bits_arr.shape[0]):
        inv_a = 1.0 / a_sp[i]
        n_lv_m1 = n_lvs[i] - 1.0
        coeff = c_sp[i] * softmask[i] / n_lv_m1
        x_t = jnp.clip(xr * inv_a, 0.0, 1.0)
        x_bar = x_bar + jnp.round(x_t * n_lv_m1) * coeff
    return x_bar.astype(x.dtype), jnp.sum(softmask * bits_arr)


# ---------------------------------- main ----------------------------------- #
if __name__ == "__main__":
    key = jax.random.PRNGKey(0)
    k_x, k_gumbel = jax.random.split(key)

    # Activation tensor (NCHW, as produced by a conv layer).
    x = jax.random.normal(k_x, (2, 4, 16, 16), dtype=jnp.float32)

    # Deterministic parameters, mirroring Q_ReLU.initialize(bits, offset, diff):
    bits = [2.0, 4.0, 8.0]
    offset, diff = 1.0, 0.5
    K = len(bits)
    fill = float(np.log(np.exp(offset + diff) - 1.0))            # a.data.fill_(...)
    a_param = jnp.full((K,), fill, dtype=jnp.float32)
    c_param = jnp.full((K,), fill, dtype=jnp.float32)
    theta = jnp.ones((K,), dtype=jnp.float32) / K                # torch.ones(K) / K

    x_bar, act_size = q_relu_forward(x, a_param, c_param, theta, bits,
                                     gumbel_key=k_gumbel)
    x_bar = jax.block_until_ready(x_bar)
    act_size = jax.block_until_ready(act_size)

    # correctness check against pure-JAX reference
    ref_bar, ref_size = q_relu_reference(x, a_param, c_param, theta, bits,
                                         gumbel_key=k_gumbel)
    np.testing.assert_allclose(np.asarray(x_bar), np.asarray(ref_bar),
                               rtol=1e-6, atol=1e-6)
    np.testing.assert_allclose(np.asarray(act_size), np.asarray(ref_size),
                               rtol=1e-6, atol=1e-6)

    # Also exercise the fp32 passthrough branch (un-initialized module).
    y32, sz32 = q_relu_forward(x, a_param[:1], c_param[:1], theta[:1], [32.0],
                               gumbel_key=k_gumbel)
    np.testing.assert_allclose(np.asarray(y32), np.maximum(np.asarray(x), 0.0),
                               rtol=0, atol=0)
    assert float(sz32) == 32.0

    print("KERNEL_OK")
</pallas_src>

<mosaic_0001>
module attributes {stable_mosaic.version = 11 : i64} {
  func.func @_q_relu_kernel(%arg0: i32, %arg1: memref<9xf32, #tpu.memory_space<smem>>, %arg2: memref<16x128xf32, #tpu.memory_space<vmem>>, %arg3: memref<16x128xf32, #tpu.memory_space<vmem>>) attributes {dimension_semantics = [#tpu.dimension_semantics<parallel>], iteration_bounds = array<i64: 1>, scalar_prefetch = 0 : i64, scratch_operands = 0 : i64, tpu.core_type = #tpu.core_type<tc>, window_params = [{transform_indices = @transform_0, window_bounds = array<i64: 9>}, {transform_indices = @transform_1, window_bounds = array<i64: 16, 128>}, {transform_indices = @transform_2, window_bounds = array<i64: 16, 128>}]} {
    %c0 = arith.constant 0 : index
    %c0_0 = arith.constant 0 : index
    %0 = vector.load %arg2[%c0, %c0_0] : memref<16x128xf32, #tpu.memory_space<vmem>>, vector<16x128xf32>
    %cst = arith.constant 0.000000e+00 : f32
    %1 = vector.broadcast %cst : f32 to vector<16x128xf32>
    %2 = arith.maximumf %0, %1 : vector<16x128xf32>
    %cst_1 = arith.constant 0.000000e+00 : f32
    %3 = vector.broadcast %cst_1 : f32 to vector<16x128xf32>
    %c0_2 = arith.constant 0 : index
    %4 = memref.load %arg1[%c0_2] : memref<9xf32, #tpu.memory_space<smem>>
    %c1 = arith.constant 1 : index
    %5 = memref.load %arg1[%c1] : memref<9xf32, #tpu.memory_space<smem>>
    %c2 = arith.constant 2 : index
    %6 = memref.load %arg1[%c2] : memref<9xf32, #tpu.memory_space<smem>>
    %7 = vector.broadcast %4 : f32 to vector<16x128xf32>
    %8 = arith.mulf %2, %7 : vector<16x128xf32>
    %cst_3 = arith.constant 0.000000e+00 : f32
    %cst_4 = arith.constant 1.000000e+00 : f32
    %9 = vector.broadcast %cst_3 : f32 to vector<16x128xf32>
    %10 = arith.maximumf %9, %8 : vector<16x128xf32>
    %11 = vector.broadcast %cst_4 : f32 to vector<16x128xf32>
    %12 = arith.minimumf %11, %10 : vector<16x128xf32>
    %13 = vector.broadcast %5 : f32 to vector<16x128xf32>
    %14 = arith.mulf %12, %13 : vector<16x128xf32>
    %15 = math.roundeven %14 : vector<16x128xf32>
    %16 = vector.broadcast %6 : f32 to vector<16x128xf32>
    %17 = arith.mulf %15, %16 : vector<16x128xf32>
    %18 = arith.addf %3, %17 : vector<16x128xf32>
    %c3 = arith.constant 3 : index
    %19 = memref.load %arg1[%c3] : memref<9xf32, #tpu.memory_space<smem>>
    %c4 = arith.constant 4 : index
    %20 = memref.load %arg1[%c4] : memref<9xf32, #tpu.memory_space<smem>>
    %c5 = arith.constant 5 : index
    %21 = memref.load %arg1[%c5] : memref<9xf32, #tpu.memory_space<smem>>
    %22 = vector.broadcast %19 : f32 to vector<16x128xf32>
    %23 = arith.mulf %2, %22 : vector<16x128xf32>
    %cst_5 = arith.constant 0.000000e+00 : f32
    %cst_6 = arith.constant 1.000000e+00 : f32
    %24 = vector.broadcast %cst_5 : f32 to vector<16x128xf32>
    %25 = arith.maximumf %24, %23 : vector<16x128xf32>
    %26 = vector.broadcast %cst_6 : f32 to vector<16x128xf32>
    %27 = arith.minimumf %26, %25 : vector<16x128xf32>
    %28 = vector.broadcast %20 : f32 to vector<16x128xf32>
    %29 = arith.mulf %27, %28 : vector<16x128xf32>
    %30 = math.roundeven %29 : vector<16x128xf32>
    %31 = vector.broadcast %21 : f32 to vector<16x128xf32>
    %32 = arith.mulf %30, %31 : vector<16x128xf32>
    %33 = arith.addf %18, %32 : vector<16x128xf32>
    %c6 = arith.constant 6 : index
    %34 = memref.load %arg1[%c6] : memref<9xf32, #tpu.memory_space<smem>>
    %c7 = arith.constant 7 : index
    %35 = memref.load %arg1[%c7] : memref<9xf32, #tpu.memory_space<smem>>
    %c8 = arith.constant 8 : index
    %36 = memref.load %arg1[%c8] : memref<9xf32, #tpu.memory_space<smem>>
    %37 = vector.broadcast %34 : f32 to vector<16x128xf32>
    %38 = arith.mulf %2, %37 : vector<16x128xf32>
    %cst_7 = arith.constant 0.000000e+00 : f32
    %cst_8 = arith.constant 1.000000e+00 : f32
    %39 = vector.broadcast %cst_7 : f32 to vector<16x128xf32>
    %40 = arith.maximumf %39, %38 : vector<16x128xf32>
    %41 = vector.broadcast %cst_8 : f32 to vector<16x128xf32>
    %42 = arith.minimumf %41, %40 : vector<16x128xf32>
    %43 = vector.broadcast %35 : f32 to vector<16x128xf32>
    %44 = arith.mulf %42, %43 : vector<16x128xf32>
    %45 = math.roundeven %44 : vector<16x128xf32>
    %46 = vector.broadcast %36 : f32 to vector<16x128xf32>
    %47 = arith.mulf %45, %46 : vector<16x128xf32>
    %48 = arith.addf %33, %47 : vector<16x128xf32>
    %c0_9 = arith.constant 0 : index
    %c0_10 = arith.constant 0 : index
    %49 = vector.load %arg3[%c0_9, %c0_10] : memref<16x128xf32, #tpu.memory_space<vmem>>, vector<16x128xf32>
    tpu.vector_store %arg3[%c0_9, %c0_10], %48 {strides = array<i32>} : memref<16x128xf32, #tpu.memory_space<vmem>>, vector<16x128xf32>,
    return
  }
  func.func @transform_0(%arg0: i32) -> i32 {
    %c0_i32 = arith.constant 0 : i32
    %c0_i32_0 = arith.constant 0 : i32
    return %c0_i32 : i32
  }
  func.func @transform_1(%arg0: i32) -> (i32, i32) {
    %c0_i32 = arith.constant 0 : i32
    %c0_i32_0 = arith.constant 0 : i32
    return %arg0, %c0_i32 : i32, i32
  }
  func.func @transform_2(%arg0: i32) -> (i32, i32) {
    %c0_i32 = arith.constant 0 : i32
    %c0_i32_0 = arith.constant 0 : i32
    return %arg0, %c0_i32 : i32, i32
  }
}

</mosaic_0001>

<bundles_post_ra>
// kernel: tpu_custom_call.1
= control target key start
LH: loop header
LB: loop body
LE: loop exit
PB: predicated region body
PF: predicated region fallthrough
CT: control target
= control target key end

     0   :  { %7 = vsyncpa [#allocation5], 0  ;;  %s280_s0 = inlined_call_operand.hbm [shape: f32[9], index: 0, kind: input, shape index: {}]   ;;  %s281_s1 = inlined_call_operand.hbm [shape: f32[16,128], index: 1, kind: input, shape index: {}]   ;;  %s282_s2 = inlined_call_operand.hbm [shape: f32[16,128], index: 2, kind: output, shape index: {}]  }
   0x1   :  { %8 = vsyncpa [#allocation3], 0 }
   0x2   :  { %9 = vsyncpa [#allocation4], 0  ;;  %s140_s11 = scalar_lea.hbm %s280_s0, 16 }
   0x3   :  { %p141_p0 = scmp.ne.s32.totalorder %s280_s0, %s140_s11  ;;  %p144_p1 = scmp.lt.u32.totalorder %s140_s11, %s280_s0 }
   0x5   :  { %p146_p2 = pnand %p144_p1, %p141_p0 }
   0x7   :  { %149 = shalt.err (!%p146_p2)
}
   0x8   :  { %s200_s16 = smov [#allocation2]   ;;  %s201_s19 = smov [#allocation6]  }
   0x9   :  { %17 = dma.hbm_to_smem %s280_s0, 16, %s200_s16, [#allocation5]  }
   0xa   :  { %s23_s20 = sshll.u32 %s201_s19, 4  ;;  %s150_s23 = scalar_lea.hbm %s281_s1, 256  ;;  %s24_s20 = int_to_ptr.vmem [resolvable:$true] %s23_s20 }
   0xb   :  { %p151_p3 = scmp.ne.s32.totalorder %s281_s1, %s150_s23  ;;  %p154_p4 = scmp.lt.u32.totalorder %s150_s23, %s281_s1 }
   0xd   :  { %p156_p5 = pnand %p154_p4, %p151_p3 }
   0xf   :  { %159 = shalt.err (!%p156_p5)
}
  0x10   :  { %s160_s28 = scalar_lea.vmem %s24_s20, 256  ;;  %p165_p7 = scmp.lt.s32.totalorder %s24_s20, %s24_s20 }
  0x11   :  { %p161_p6 = scmp.ne.s32.totalorder %s24_s20, %s160_s28  ;;  %p166_p8 = scmp.lt.s32.totalorder %s160_s28, %s160_s28 }
  0x13   :  { %p167_p9 = por %p166_p8, %p165_p7 }
  0x15   :  { %p168_p10 = pnand %p167_p9, %p161_p6 }
  0x17   :  { %171 = shalt.err (!%p168_p10)
}
  0x18   :  { %s202_s0 = smov 128   ;;  %s203_s29 = smov 8  }
  0x19   :  { %29 = dma.hbm_to_vmem [thread:$0]  %s281_s1, 256, %s24_s20, [#allocation3], %s202_s0, %s202_s0, %s203_s29  }
  0x1a   :  { %194 = dma.done.wait [#allocation5], 16  }
  0x1b   :  { %195 = vsyncadd [#allocation5], 4294967280 }
  0x1c   :  { %196 = dma.done.wait [#allocation3], 256  }
  0x1d   :  { %197 = vsyncadd [#allocation3], 4294967040 }
  0x1e   :  { %36 = sfence }
  0x1f   :  { %v37_v0 = vld [vmem:[#allocation6] sm:$0xff]  ;;  %s41_s4 = sld [smem:[#allocation2]]  ;;  %v38_v1 = vld [vmem:[#allocation6 + $0x8] sm:$0xff]  ;;  %s123_s5 = sld [smem:[#allocation2 + $0x3]] }
  0x20   :  { %s247_s6 = sld [smem:[#allocation2 + $0x1]]  ;;  %v39_v2 = vmax.f32 %v37_v0, 0.0  ;;  %s249_s7 = sld [smem:[#allocation2 + $0x4]]  ;;  %v40_v3 = vmax.f32 %v38_v1, 0.0 }
  0x21   :  { %s126_s8 = sld [smem:[#allocation2 + $0x6]]  ;;  %s251_s9 = sld [smem:[#allocation2 + $0x7]] }
  0x22   :  { %s253_s1 = sld [smem:[#allocation2 + $0x2]]  ;;  %s255_s10 = sld [smem:[#allocation2 + $0x5]] }
  0x23   :  { %s257_s11 = sld [smem:[#allocation2 + $0x8]]  ;;  %s204_s12 = smov [#allocation7]  }
  0x24   :  { %s108_s13 = sshll.u32 %s204_s12, 4  ;;  %s109_s13 = int_to_ptr.vmem [resolvable:$true] %s108_s13 }
  0x25   :  { %v44_v4 = vstv %s41_s4  ;;  %v64_v6 = vstv %s123_s5  ;;  %s172_s14 = scalar_lea.vmem %s109_s13, 256  ;;  %p177_p12 = scmp.lt.s32.totalorder %s109_s13, %s109_s13 }
  0x26   :  { %v45_v5 = vmul.f32 %v44_v4, %v39_v2  ;;  %v46_v7 = vmul.f32 %v44_v4, %v40_v3  ;;  %v65_v8 = vmul.f32 %v64_v6, %v39_v2  ;;  %v66_v9 = vmul.f32 %v64_v6, %v40_v3  ;;  %p173_p11 = scmp.ne.s32.totalorder %s109_s13, %s172_s14  ;;  %p178_p13 = scmp.lt.s32.totalorder %s172_s14, %s172_s14 }
  0x27   :  { %v84_v11 = vstv %s126_s8  ;;  %v51_v13 = vstv %s247_s6  ;;  %v71_v18 = vstv %s249_s7  ;;  %v91_v25 = vstv %s251_s9 }
  0x28   :  { %v47_v10 = vmax.f32 %v45_v5, 0.0  ;;  %v48_v12 = vmax.f32 %v46_v7, 0.0  ;;  %v67_v14 = vmax.f32 %v65_v8, 0.0  ;;  %v85_v15 = vmul.f32 %v84_v11, %v39_v2  ;;  %p179_p0 = por %p178_p13, %p177_p12 }
  0x29   :  { %v68_v16 = vmax.f32 %v66_v9, 0.0  ;;  %v86_v20 = vmul.f32 %v84_v11, %v40_v3  ;;  %v56_v28 = vstv %s253_s1  ;;  %v76_v33 = vstv %s255_s10 }
  0x2a   :  { %v49_v17 = vmin.f32 %v47_v10, 1.0  ;;  %v50_v19 = vmin.f32 %v48_v12, 1.0  ;;  %v69_v21 = vmin.f32 %v67_v14, 1.0  ;;  %v87_v22 = vmax.f32 %v85_v15, 0.0  ;;  %p180_p1 = pnand %p179_p0, %p173_p11 }
  0x2b   :  { %v70_v23 = vmin.f32 %v68_v16, 1.0  ;;  %v88_v27 = vmax.f32 %v86_v20, 0.0  ;;  %v96_v40 = vstv %s257_s11 }
  0x2c   :  { %v52_v24 = vmul.f32 %v51_v13, %v49_v17  ;;  %v53_v26 = vmul.f32 %v51_v13, %v50_v19  ;;  %v72_v29 = vmul.f32 %v71_v18, %v69_v21  ;;  %v89_v30 = vmin.f32 %v87_v22, 1.0 }
  0x2d   :  { %v73_v31 = vmul.f32 %v71_v18, %v70_v23  ;;  %v90_v35 = vmin.f32 %v88_v27, 1.0 }
  0x2e   :  { %v129_v32 = vround.rtne.f32 %v52_v24  ;;  %v130_v34 = vround.rtne.f32 %v53_v26  ;;  %v131_v36 = vround.rtne.f32 %v72_v29  ;;  %v92_v37 = vmul.f32 %v91_v25, %v89_v30 }
  0x2f   :  { %v132_v38 = vround.rtne.f32 %v73_v31  ;;  %v93_v42 = vmul.f32 %v91_v25, %v90_v35 }
  0x30   :  { %v57_v39 = vmul.f32 %v129_v32, %v56_v28  ;;  %v58_v41 = vmul.f32 %v130_v34, %v56_v28  ;;  %v77_v43 = vmul.f32 %v131_v36, %v76_v33  ;;  %v133_v44 = vround.rtne.f32 %v92_v37 }
  0x31   :  { %v78_v45 = vmul.f32 %v132_v38, %v76_v33  ;;  %v134_v46 = vround.rtne.f32 %v93_v42 }
  0x32   :  { %v79_v47 = vadd.f32 %v77_v43, %v57_v39  ;;  %v97_v48 = vmul.f32 %v133_v44, %v96_v40 }
  0x33   :  { %v80_v49 = vadd.f32 %v78_v45, %v58_v41  ;;  %v98_v50 = vmul.f32 %v134_v46, %v96_v40 }
  0x34   :  { %v99_v51 = vadd.f32 %v97_v48, %v79_v47 }
  0x35   :  { %v100_v52 = vadd.f32 %v98_v50, %v80_v49 }
  0x36   :  { %101 = vst [vmem:[#allocation7] sm:$0xff] %v99_v51 }
  0x37   :  { %102 = vst [vmem:[#allocation7 + $0x8] sm:$0xff] %v100_v52 }
  0x38   :  { %183 = shalt.err (!%p180_p1)
}
  0x39   :  { %s184_s17 = scalar_lea.hbm %s282_s2, 256 }
  0x3a   :  { %p185_p2 = scmp.ne.s32.totalorder %s282_s2, %s184_s17  ;;  %p188_p3 = scmp.lt.u32.totalorder %s184_s17, %s282_s2 }
  0x3c   :  { %p190_p4 = pnand %p188_p3, %p185_p2 }
  0x3e   :  { %193 = shalt.err (!%p190_p4)
}
  0x3f   :  { %114 = dma.vmem_to_hbm [thread:$0]  %s109_s13, 256, %s282_s2, [#allocation4], %s202_s0, %s202_s0, %s203_s29  }
  0x40   :  { %198 = dma.done.wait [#allocation4], 256  }
  0x41   :  { %199 = vsyncadd [#allocation4], 4294967040 }
  0x42   :  { %118 = vsyncpa [#allocation3], 1 }
  0x43   :  { %119 = vsyncpa [#allocation4], 1 }
  0x44   :  { %120 = vsyncpa [#allocation5], 1 }

</bundles_post_ra>
